<compile_context>
chip_gen: v5e
topology: v5e:2x2
jax: 0.10.0
libtpu: 0.0.40
codegen_flags: <defaults>
</compile_context>

<pallas_src>
import jax
import jax.numpy as jnp
from jax.experimental import pallas as pl
from jax.experimental.pallas import tpu as pltpu


def _round_up(n, m):
    return ((n + m - 1) // m) * m


def _batch_axis_semantics():
    """CORE_PARALLEL engages both v7x TensorCores; plain PARALLEL elsewhere (1 TC/chip)."""
    try:
        kind = jax.devices()[0].device_kind.lower()
    except Exception:
        kind = ""
    if "v7" in kind:
        return (pltpu.CORE_PARALLEL,)
    return (pltpu.PARALLEL,)


def _mlp_kernel(x_ref, w1_ref, b1_ref, w2_ref, b2_ref, w3_ref, c_ref, o_ref):
    # x:  (TB, G)  f32  (cast to bf16 in-kernel; VPU cast is free, halves x HBM traffic)
    # w1: (G, E)   bf16    b1: (1, E) f32
    # w2: (E, H)   bf16    b2: (1, H) f32
    # w3: (1, H)   f32     c:  (1,)   f32 in SMEM  (= b3 + 3.0)
    # o:  (1, TB)  f32     (lane-dense row per batch tile)
    x = x_ref[...].astype(jnp.bfloat16)

    # genre_layer: Linear + ReLU (+ Dropout -> identity at inference)
    h1 = jnp.dot(x, w1_ref[...], preferred_element_type=jnp.float32) + b1_ref[...]
    h1 = jnp.maximum(h1, 0.0)
    # TODO(synk): Dropout(0.2) is a no-op in eval mode; training-mode stochastic masking not implemented.

    # hidden_layer: Linear + ReLU (+ Dropout -> identity)
    h2 = jnp.dot(h1.astype(jnp.bfloat16), w2_ref[...],
                 preferred_element_type=jnp.float32) + b2_ref[...]
    h2 = jnp.maximum(h2, 0.0)

    # output_layer (out_features == 1): contract (1, H) against (TB, H) on their last dims
    # -> (1, TB).  Result is already lane-major, so the store is unmasked and lane-dense.
    out_row = jax.lax.dot_general(
        w3_ref[...], h2,
        dimension_numbers=(((1,), (1,)), ((), ())),
        precision=jax.lax.Precision.HIGHEST,
        preferred_element_type=jnp.float32)
    o_ref[...] = (out_row + c_ref[0]).astype(o_ref.dtype)


def content_based_nn_forward(x, w1, b1, w2, b2, w3, b3, *, tile_b=None):
    """Eval-mode forward of ContentBasedNN.

    x: (B, n_genres) float; weights pre-transposed to (in, out); w3 may be (hid,1)/(hid,)/(1,hid).
    Returns (B, 1) float32 predictions.  x/w1/w2 use bf16 MXU math with f32 accumulation."""
    B, n_genres = x.shape
    emb = w1.shape[1]
    hid = w2.shape[1]

    x = x.astype(jnp.float32)                 # stays f32 in HBM; bf16 cast happens in-kernel
    w1b = w1.astype(jnp.bfloat16)
    w2b = w2.astype(jnp.bfloat16)
    b1f = jnp.reshape(b1, (1, emb)).astype(jnp.float32)
    b2f = jnp.reshape(b2, (1, hid)).astype(jnp.float32)
    w3_row = jnp.reshape(w3, (1, hid)).astype(jnp.float32)
    c = (jnp.reshape(b3, (-1,))[:1] + 3.0).astype(jnp.float32)   # (1,) scalar: b3 + 3.0

    # Batch tile scales with B (up to 4096): 16-aligned for bf16 sublane packing, 256-aligned
    # when large for the MXU M-dim and lane-dense 128-wide stores.  Ragged tail blocks are
    # handled by Pallas (no wrapper-side padding pass over x).
    if tile_b is None:
        tile_b = min(4096, _round_up(B, 16))
    tile_b = max(16, _round_up(int(tile_b), 16))
    if tile_b >= 256:
        tile_b = _round_up(tile_b, 256)

    num_tiles = pl.cdiv(B, tile_b)

    const2d = lambda shape: pl.BlockSpec(shape, lambda i: (0, 0))

    out = pl.pallas_call(
        _mlp_kernel,
        out_shape=jax.ShapeDtypeStruct((num_tiles, tile_b), jnp.float32),
        grid=(num_tiles,),
        in_specs=[
            pl.BlockSpec((tile_b, n_genres), lambda i: (i, 0)),   # x batch tiles (ragged tail OK)
            const2d((n_genres, emb)),                             # w1 (resident)
            const2d((1, emb)),                                    # b1
            const2d((emb, hid)),                                  # w2
            const2d((1, hid)),                                    # b2
            const2d((1, hid)),                                    # w3 row
            pl.BlockSpec(memory_space=pltpu.MemorySpace.SMEM),    # b3 + 3.0 scalar
        ],
        out_specs=pl.BlockSpec((1, tile_b), lambda i: (i, 0)),    # lane-dense row per tile
        compiler_params=pltpu.CompilerParams(
            dimension_semantics=_batch_axis_semantics(),
            vmem_limit_bytes=32 * 1024 * 1024,
        ),
    )(x, w1b, b1f, w2b, b2f, w3_row, c)

    # (num_tiles, tile_b) -> (B, 1); reshape is contiguous (no copy), tail rows discarded.
    return out.reshape(num_tiles * tile_b, 1)[:B]


def _init_linear(key, fan_in, fan_out):
    """Deterministic init mimicking nn.Linear (uniform +/- 1/sqrt(fan_in)).
    Weight returned as (fan_in, fan_out) (already transposed); bias as (1, fan_out)."""
    kw, kb = jax.random.split(key)
    bound = 1.0 / jnp.sqrt(fan_in)
    w = jax.random.uniform(kw, (fan_in, fan_out), jnp.float32, -bound, bound)
    b = jax.random.uniform(kb, (1, fan_out), jnp.float32, -bound, bound)
    return w, b


def _reference(x, w1, b1, w2, b2, w3, b3, cast_bf16):
    """Pure-JAX reference. cast_bf16=True mimics the kernel's bf16-input / f32-accum math."""
    hi = jax.lax.Precision.HIGHEST
    if cast_bf16:
        xf = x.astype(jnp.bfloat16).astype(jnp.float32)
        w1f = w1.astype(jnp.bfloat16).astype(jnp.float32)
        w2f = w2.astype(jnp.bfloat16).astype(jnp.float32)
    else:
        xf, w1f, w2f = x, w1, w2
    h1 = jnp.maximum(jnp.dot(xf, w1f, precision=hi) + b1, 0.0)
    if cast_bf16:
        h1 = h1.astype(jnp.bfloat16).astype(jnp.float32)
    h2 = jnp.maximum(jnp.dot(h1, w2f, precision=hi) + b2, 0.0)
    out = jnp.sum(h2 * jnp.reshape(w3, (1, -1)), axis=-1, keepdims=True)
    return out + jnp.reshape(b3, (1, 1)) + 3.0


if __name__ == "__main__":
    # Small shapes consistent with the module's forward.
    B = 8
    n_genres = 16
    embedding_dim = 128
    hidden_dim = 64

    root = jax.random.PRNGKey(0)
    kx, k1, k2, k3, kx2, kx3 = jax.random.split(root, 6)

    x = jax.random.normal(kx, (B, n_genres), jnp.float32)
    w1, b1 = _init_linear(k1, n_genres, embedding_dim)
    w2, b2 = _init_linear(k2, embedding_dim, hidden_dim)
    w3, b3 = _init_linear(k3, hidden_dim, 1)

    out = jax.block_until_ready(content_based_nn_forward(x, w1, b1, w2, b2, w3, b3))
    assert out.shape == (B, 1)

    ref_bf16 = _reference(x, w1, b1, w2, b2, w3, b3, cast_bf16=True)
    ref_f32 = _reference(x, w1, b1, w2, b2, w3, b3, cast_bf16=False)
    assert jnp.allclose(out, ref_bf16, atol=1e-3, rtol=1e-3), "mismatch vs bf16 reference"
    assert jnp.allclose(out, ref_f32, atol=5e-2, rtol=5e-2), "mismatch vs f32 reference"

    # Multi-tile grid + ragged last block (B not divisible by tile_b, no wrapper padding).
    B2 = 200
    x2 = jax.random.normal(kx2, (B2, n_genres), jnp.float32)
    out2 = jax.block_until_ready(
        content_based_nn_forward(x2, w1, b1, w2, b2, w3, b3, tile_b=64))
    ref2 = _reference(x2, w1, b1, w2, b2, w3, b3, cast_bf16=True)
    assert out2.shape == (B2, 1)
    assert jnp.allclose(out2, ref2, atol=1e-3, rtol=1e-3), "mismatch on ragged tiled batch"

    # Default (auto) tile path: 256-aligned tile larger than B, single ragged block.
    B3 = 1000
    x3 = jax.random.normal(kx3, (B3, n_genres), jnp.float32)
    out3 = jax.block_until_ready(content_based_nn_forward(x3, w1, b1, w2, b2, w3, b3))
    ref3 = _reference(x3, w1, b1, w2, b2, w3, b3, cast_bf16=True)
    assert out3.shape == (B3, 1)
    assert jnp.allclose(out3, ref3, atol=1e-3, rtol=1e-3), "mismatch on auto-tiled batch"

    print("KERNEL_OK")
</pallas_src>

<mosaic_0001>
module attributes {stable_mosaic.version = 11 : i64} {
  func.func @_mlp_kernel(%arg0: i32, %arg1: memref<16x16xf32, #tpu.memory_space<vmem>>, %arg2: memref<16x128xbf16, #tpu.memory_space<vmem>>, %arg3: memref<1x128xf32, #tpu.memory_space<vmem>>, %arg4: memref<128x64xbf16, #tpu.memory_space<vmem>>, %arg5: memref<1x64xf32, #tpu.memory_space<vmem>>, %arg6: memref<1x64xf32, #tpu.memory_space<vmem>>, %arg7: memref<1xf32, #tpu.memory_space<smem>>, %arg8: memref<1x16xf32, #tpu.memory_space<vmem>>) attributes {dimension_semantics = [#tpu.dimension_semantics<parallel>], iteration_bounds = array<i64: 1>, scalar_prefetch = 0 : i64, scratch_operands = 0 : i64, tpu.core_type = #tpu.core_type<tc>, window_params = [{transform_indices = @transform_0, window_bounds = array<i64: 16, 16>}, {pipeline_mode = #tpu.pipeline_mode<synchronous>, transform_indices = @transform_1, window_bounds = array<i64: 16, 128>}, {pipeline_mode = #tpu.pipeline_mode<synchronous>, transform_indices = @transform_2, window_bounds = array<i64: 1, 128>}, {pipeline_mode = #tpu.pipeline_mode<synchronous>, transform_indices = @transform_3, window_bounds = array<i64: 128, 64>}, {pipeline_mode = #tpu.pipeline_mode<synchronous>, transform_indices = @transform_4, window_bounds = array<i64: 1, 64>}, {pipeline_mode = #tpu.pipeline_mode<synchronous>, transform_indices = @transform_5, window_bounds = array<i64: 1, 64>}, {transform_indices = @transform_6, window_bounds = array<i64: 1>}, {transform_indices = @transform_7, window_bounds = array<i64: 1, 16>}]} {
    %c0 = arith.constant 0 : index
    %c0_0 = arith.constant 0 : index
    %0 = vector.load %arg1[%c0, %c0_0] : memref<16x16xf32, #tpu.memory_space<vmem>>, vector<16x16xf32>
    %1 = arith.truncf %0 : vector<16x16xf32> to vector<16x16xbf16>
    %c0_1 = arith.constant 0 : index
    %c0_2 = arith.constant 0 : index
    %2 = vector.load %arg2[%c0_1, %c0_2] : memref<16x128xbf16, #tpu.memory_space<vmem>>, vector<16x128xbf16>
    %cst = arith.constant dense<0.000000e+00> : vector<16x128xf32>
    %3 = tpu.matmul %1, %2, %cst {dimension_numbers = #tpu.dot_dimension_numbers<[1], [0], [0], [1], [0, 0, 1, 1], [], []>} : vector<16x16xbf16>, vector<16x128xbf16>, vector<16x128xf32> -> vector<16x128xf32>
    %c0_3 = arith.constant 0 : index
    %c0_4 = arith.constant 0 : index
    %4 = vector.load %arg3[%c0_3, %c0_4] : memref<1x128xf32, #tpu.memory_space<vmem>>, vector<1x128xf32>
    %5 = vector.broadcast %4 : vector<1x128xf32> to vector<16x128xf32>
    %6 = arith.addf %3, %5 : vector<16x128xf32>
    %cst_5 = arith.constant 0.000000e+00 : f32
    %7 = vector.broadcast %cst_5 : f32 to vector<16x128xf32>
    %8 = arith.maximumf %6, %7 : vector<16x128xf32>
    %9 = arith.truncf %8 : vector<16x128xf32> to vector<16x128xbf16>
    %c0_6 = arith.constant 0 : index
    %c0_7 = arith.constant 0 : index
    %10 = vector.load %arg4[%c0_6, %c0_7] : memref<128x64xbf16, #tpu.memory_space<vmem>>, vector<128x64xbf16>
    %cst_8 = arith.constant dense<0.000000e+00> : vector<16x64xf32>
    %11 = tpu.matmul %9, %10, %cst_8 {dimension_numbers = #tpu.dot_dimension_numbers<[1], [0], [0], [1], [0, 0, 1, 1], [], []>} : vector<16x128xbf16>, vector<128x64xbf16>, vector<16x64xf32> -> vector<16x64xf32>
    %c0_9 = arith.constant 0 : index
    %c0_10 = arith.constant 0 : index
    %12 = vector.load %arg5[%c0_9, %c0_10] : memref<1x64xf32, #tpu.memory_space<vmem>>, vector<1x64xf32>
    %13 = vector.broadcast %12 : vector<1x64xf32> to vector<16x64xf32>
    %14 = arith.addf %11, %13 : vector<16x64xf32>
    %cst_11 = arith.constant 0.000000e+00 : f32
    %15 = vector.broadcast %cst_11 : f32 to vector<16x64xf32>
    %16 = arith.maximumf %14, %15 : vector<16x64xf32>
    %c0_12 = arith.constant 0 : index
    %c0_13 = arith.constant 0 : index
    %17 = vector.load %arg6[%c0_12, %c0_13] : memref<1x64xf32, #tpu.memory_space<vmem>>, vector<1x64xf32>
    %cst_14 = arith.constant dense<0.000000e+00> : vector<1x16xf32>
    %18 = tpu.matmul %17, %16, %cst_14 {dimension_numbers = #tpu.dot_dimension_numbers<[1], [1], [0], [0], [0, 0, 1, 0], [], []>, precision = #tpu.contract_precision<fp32>} : vector<1x64xf32>, vector<16x64xf32>, vector<1x16xf32> -> vector<1x16xf32>
    %c0_15 = arith.constant 0 : index
    %19 = memref.load %arg7[%c0_15] : memref<1xf32, #tpu.memory_space<smem>>
    %20 = vector.broadcast %19 : f32 to vector<1x16xf32>
    %21 = arith.addf %18, %20 : vector<1x16xf32>
    %c0_16 = arith.constant 0 : index
    %c0_17 = arith.constant 0 : index
    %22 = vector.load %arg8[%c0_16, %c0_17] : memref<1x16xf32, #tpu.memory_space<vmem>>, vector<1x16xf32>
    tpu.vector_store %arg8[%c0_16, %c0_17], %21 {strides = array<i32>} : memref<1x16xf32, #tpu.memory_space<vmem>>, vector<1x16xf32>,
    return
  }
  func.func @transform_0(%arg0: i32) -> (i32, i32) {
    %c0_i32 = arith.constant 0 : i32
    %c0_i32_0 = arith.constant 0 : i32
    return %arg0, %c0_i32 : i32, i32
  }
  func.func @transform_1(%arg0: i32) -> (i32, i32) {
    %c0_i32 = arith.constant 0 : i32
    %c0_i32_0 = arith.constant 0 : i32
    %c0_i32_1 = arith.constant 0 : i32
    return %c0_i32, %c0_i32_0 : i32, i32
  }
  func.func @transform_2(%arg0: i32) -> (i32, i32) {
    %c0_i32 = arith.constant 0 : i32
    %c0_i32_0 = arith.constant 0 : i32
    %c0_i32_1 = arith.constant 0 : i32
    return %c0_i32, %c0_i32_0 : i32, i32
  }
  func.func @transform_3(%arg0: i32) -> (i32, i32) {
    %c0_i32 = arith.constant 0 : i32
    %c0_i32_0 = arith.constant 0 : i32
    %c0_i32_1 = arith.constant 0 : i32
    return %c0_i32, %c0_i32_0 : i32, i32
  }
  func.func @transform_4(%arg0: i32) -> (i32, i32) {
    %c0_i32 = arith.constant 0 : i32
    %c0_i32_0 = arith.constant 0 : i32
    %c0_i32_1 = arith.constant 0 : i32
    return %c0_i32, %c0_i32_0 : i32, i32
  }
  func.func @transform_5(%arg0: i32) -> (i32, i32) {
    %c0_i32 = arith.constant 0 : i32
    %c0_i32_0 = arith.constant 0 : i32
    %c0_i32_1 = arith.constant 0 : i32
    return %c0_i32, %c0_i32_0 : i32, i32
  }
  func.func @transform_6(%arg0: i32) -> i32 {
    %c0_i32 = arith.constant 0 : i32
    %c0_i32_0 = arith.constant 0 : i32
    return %c0_i32 : i32
  }
  func.func @transform_7(%arg0: i32) -> (i32, i32) {
    %c0_i32 = arith.constant 0 : i32
    %c0_i32_0 = arith.constant 0 : i32
    return %arg0, %c0_i32 : i32, i32
  }
}

</mosaic_0001>

<bundles_post_ra>
// kernel: tpu_custom_call.1
= control target key start
LH: loop header
LB: loop body
LE: loop exit
PB: predicated region body
PF: predicated region fallthrough
CT: control target
= control target key end

     0   :  { %vm44_vm0 = vcmask 130048   ;;  %s503_s0 = inlined_call_operand.vmem [shape: f32[8,16], index: 0, kind: input, shape index: {}]   ;;  %s504_s1 = inlined_call_operand.vmem [shape: bf16[16,128], index: 1, kind: input, shape index: {}]   ;;  %s505_s2 = inlined_call_operand.vmem [shape: f32[1,128], index: 2, kind: input, shape index: {}]   ;;  %s506_s3 = inlined_call_operand.vmem [shape: bf16[128,64], index: 3, kind: input, shape index: {}]   ;;  %s507_s4 = inlined_call_operand.vmem [shape: f32[1,64], index: 4, kind: input, shape index: {}]   ;;  %s508_s5 = inlined_call_operand.vmem [shape: f32[1,64], index: 5, kind: input, shape index: {}]   ;;  %s509_s6 = inlined_call_operand.<no memory space> [shape: f32[1], index: 6, kind: input, shape index: {}]   ;;  %s510_s7 = inlined_call_operand.hbm [shape: f32[1,16], index: 7, kind: output, shape index: {}]  }
   0x1   :  { %v376_v0 = vld [vmem:[%s504_s1] sm:$0xff]  ;;  %v30_v2 = vld [vmem:[%s503_s0 + $0x8] sm:$0xff]  ;;  %v384_v4 = vld [vmem:[%s506_s3 + $0x38] sm:$0xff] }
   0x2   :  { %v29_v1 = vld [vmem:[%s503_s0] sm:$0xff]  ;;  %55 = vmatpush.bf16.msra.mxu0 %v376_v0  ;;  %133 = vmatpush.bf16.msra.mxu1 %v384_v4  ;;  %v383_v5 = vld [vmem:[%s506_s3 + $0x30] sm:$0xff] }
   0x3   :  { %v31_v3 = vpack.c.bf16 %v30_v2, %v29_v1 }
   0x4   :  { %13 = vsyncpa [#allocation4], 0  ;;  %v382_v6 = vld [vmem:[%s506_s3 + $0x28] sm:$0xff]  ;;  %v381_v7 = vld [vmem:[%s506_s3 + $0x20] sm:$0xff]  ;;  %vm152_vm1 = vcmask 523264   ;;  %v151_v47 = vstv %s509_s6  ;;  %s330_s29 = sshll.u32 %s510_s7, 4  ;;  %s331_s29 = int_to_ptr.hbm [resolvable:$true] %s330_s29 }
   0x5   :  { %343 = vmatmul.msk.bf16.vlgmr.msra.gmra.mxu0 %vm44_vm0, %v31_v3  ;;  %v380_v8 = vld [vmem:[%s506_s3 + $0x18] sm:$0xff]  ;;  %v379_v9 = vld [vmem:[%s506_s3 + $0x10] sm:$0xff]  ;;  %v378_v10 = vld [vmem:[%s506_s3 + $0x8] sm:$0xff]  ;;  %vm321_vm2 = vcmask 122880  }
   0x6   :  { %134 = vmatpush.bf16.msra.mxu1 %v383_v5  ;;  %v377_v11 = vld [vmem:[%s506_s3] sm:$0xff] }
   0x7   :  { %v386_v13 = vld [vmem:[%s505_s2] ss:$0 sm:$0xff] }
   0x8   :  { %v387_v20 = vld [vmem:[%s507_s4] ss:$0 sm:$0xff]  ;;  %s414_s4 = smov [#allocation3]  }
   0x9   :  { %v149_v21 = vld [vmem:[%s508_s5] sm:$0x1]  ;;  %s328_s5 = sshll.u32 %s414_s4, 4  ;;  %s329_s5 = int_to_ptr.vmem [resolvable:$true] %s328_s5 }
   0xa   :  { %135 = vmatpush.bf16.msra.mxu1 %v382_v6  ;;  %v154_v23 = vsel %vm152_vm1, %v149_v21, 0 }
   0xb   :  { %v180_v26 = vand.u32 4294901760, %v154_v23 }
   0xd   :  { %v181_v28 = vsub.f32 %v154_v23, %v180_v26 }
   0xe   :  { %136 = vmatpush.bf16.msra.mxu1 %v381_v7 }
   0xf   :  { %v182_v33 = vand.u32 4294901760, %v181_v28 }
  0x11   :  { %v183_v37 = vsub.f32 %v181_v28, %v182_v33 }
  0x12   :  { %137 = vmatpush.bf16.msra.mxu1 %v380_v8 }
  0x13   :  { %v184_v41 = vand.u32 4294901760, %v183_v37 }
  0x16   :  { %138 = vmatpush.bf16.msra.mxu1 %v379_v9 }
  0x1a   :  { %139 = vmatpush.bf16.msra.mxu1 %v378_v10 }
  0x1e   :  { %140 = vmatpush.bf16.msra.mxu1 %v377_v11 }
  0x82   :  { %v57_v12 = vpop.f32.mrf.mxu0 }
  0x83   :  { %v58_v14 = vadd.f32 %v386_v13, %v57_v12 }
  0x85   :  { %v62_v17 = vmax.f32 %v58_v14, 0.0 }
  0x8a   :  { %v59_v15 = vpop.f32.mrf.mxu0 }
  0x8b   :  { %v60_v16 = vadd.f32 %v386_v13, %v59_v15 }
  0x8d   :  { %v63_v18 = vmax.f32 %v60_v16, 0.0 }
  0x8f   :  { %v64_v19 = vpack.c.bf16 %v63_v18, %v62_v17 }
  0x91   :  { %141 = vmatmul.bf16.vlgmr.msra.gmra.mxu1 %v64_v19 }
 0x10e   :  { %v142_v22 = vpop.f32.mrf.mxu1 }
 0x10f   :  { %v143_v24 = vadd.f32 %v387_v20, %v142_v22 }
 0x111   :  { %v147_v25 = vmax.f32 %v143_v24, 0.0 }
 0x113   :  { %v157_v27 = vsel %vm152_vm1, %v147_v25, 0 }
 0x114   :  { %v178_v31 = vand.u32 4294901760, %v157_v27 }
 0x116   :  { %v144_v29 = vpop.f32.mrf.mxu1  ;;  %v210_v35 = vsub.f32 %v157_v27, %v178_v31 }
 0x117   :  { %v145_v30 = vadd.f32 %v387_v20, %v144_v29 }
 0x118   :  { %v211_v40 = vand.u32 4294901760, %v210_v35 }
 0x119   :  { %v148_v32 = vmax.f32 %v145_v30, 0.0 }
 0x11a   :  { %v212_v44 = vsub.f32 %v210_v35, %v211_v40 }
 0x11b   :  { %v160_v34 = vsel %vm152_vm1, %v148_v32, 0 }
 0x11c   :  { %v176_v36 = vand.u32 4294901760, %v160_v34  ;;  %v213_v45 = vand.u32 4294901760, %v212_v44 }
 0x11e   :  { %v204_v38 = vsub.f32 %v160_v34, %v176_v36  ;;  %177 = vmatpush.xpose.msra.mxu2 %v176_v36 }
 0x120   :  { %v205_v39 = vand.u32 4294901760, %v204_v38 }
 0x122   :  { %179 = vmatpush.xpose.msra.mxu2 %v178_v31  ;;  %288 = vmatpush.xpose.msrb.mxu0 %v205_v39  ;;  %v206_v42 = vsub.f32 %v204_v38, %v205_v39 }
 0x124   :  { %v207_v43 = vand.u32 4294901760, %v206_v42 }
 0x125   :  { %185 = vmatmul.f32.vlgmr.msra.gmra.mxu2 %v184_v41 }
 0x126   :  { %236 = vmatpush.xpose.msrb.mxu2 %v204_v38  ;;  %208 = vmatpush.xpose.msra.mxu3 %v207_v43 }
 0x127   :  { %292 = vmatpush.xpose.msrb.mxu0 %v211_v40 }
 0x12a   :  { %239 = vmatpush.xpose.msrb.mxu2 %v210_v35  ;;  %294 = vmatmul.f32.vlgmr.msrb.gmra.mxu0 %v180_v26 }
 0x12b   :  { %214 = vmatpush.xpose.msra.mxu3 %v213_v45 }
 0x12d   :  { %242 = vmatmul.f32.vlgmr.msrb.gmra.mxu2 %v181_v28 }
 0x12e   :  { %313 = vmatpush.xpose.msra.mxu2 %v176_v36  ;;  %216 = vmatmul.f32.vlgmr.msra.gmra.mxu3 %v180_v26 }
 0x12f   :  { %261 = vmatpush.xpose.msrb.mxu3 %v176_v36 }
 0x132   :  { %315 = vmatpush.xpose.msra.mxu2 %v178_v31 }
 0x133   :  { %263 = vmatpush.xpose.msrb.mxu3 %v178_v31 }
 0x135   :  { %317 = vmatmul.f32.vlgmr.msra.gmra.mxu2 %v180_v26 }
 0x136   :  { %267 = vmatmul.f32.vlgmr.msrb.gmra.mxu3 %v182_v33 }
 0x1a7   :  { %v295_v54 = vpop.f32.mrf.mxu0 }
 0x1a8   :  { %v186_v46 = vpop.f32.mrf.mxu2 }
 0x1a9   :  { %v187_v49 = vadd.f32 %v186_v46, %v151_v47 }
 0x1b0   :  { %v243_v50 = vpop.f32.mrf.mxu2 }
 0x1b1   :  { %v217_v48 = vpop.f32.mrf.mxu3 }
 0x1b2   :  { %v218_v51 = vadd.f32 %v217_v48, %v187_v49 }
 0x1b4   :  { %v244_v52 = vadd.f32 %v243_v50, %v218_v51 }
 0x1b8   :  { %v318_v56 = vpop.f32.mrf.mxu2 }
 0x1b9   :  { %v268_v53 = vpop.f32.mrf.mxu3 }
 0x1ba   :  { %v269_v55 = vadd.f32 %v268_v53, %v244_v52 }
 0x1bc   :  { %v296_v57 = vadd.f32 %v295_v54, %v269_v55 }
 0x1be   :  { %v319_v58 = vadd.f32 %v318_v56, %v296_v57 }
 0x1c0   :  { %322 = vst.msk [vmem:[#allocation3] sm:$0x1] %vm321_vm2, %v319_v58 }
 0x1c1   :  { %333 = dma.vmem_to_hbm [thread:$0]  %s329_s5, 16, %s331_s29, [#allocation4]  }
 0x1c2   :  { %412 = dma.done.wait [#allocation4], 16  }
 0x1c3   :  { %413 = vsyncadd [#allocation4], 4294967280 }
 0x1c4   :  { %338 = vsyncpa [#allocation4], 1 }

</bundles_post_ra>
